<compile_context>
chip_gen: v7x
topology: tpu7x:2x2x1
jax: 0.10.0
libtpu: 0.0.40
codegen_flags: <defaults>
</compile_context>

<pallas_src>
import jax
import jax.numpy as jnp
from jax.experimental import pallas as pl
from jax.experimental.pallas import tpu as pltpu


def _blend_kernel(alpha_ref, img_ref, patch_ref, out_ref):
    a = alpha_ref[0, 0]                       # scalar in SMEM
    img = img_ref[...]
    # img*(1-a) + patch*a == img + a*(patch - img)
    # patch block may be (1, tc) and broadcasts over the sublane (row) dim.
    out_ref[...] = img + a * (patch_ref[...] - img)


def _pick_row_tile(b):
    # Block row dim must be a multiple of 8 or equal the full extent.
    if b <= 8 or b % 8 != 0:
        return b
    return 8


def _pick_col_tile(p, rows, max_bytes=1 << 20):
    # Block col (lane) dim must be a multiple of 128 dividing p, or full p.
    if p % 128 != 0:
        return p
    budget = max(128, (max_bytes // (rows * 4)) // 128 * 128)
    tc = 128
    for cand in range(128, min(p, budget) + 1, 128):
        if p % cand == 0:
            tc = cand
    return tc


def patch_applier(img_batch, adv_patch, alpha):
    """img_batch * (1 - alpha) + adv_patch * alpha  (NCHW, like PyTorch)."""
    img_batch = jnp.asarray(img_batch, jnp.float32)
    adv_patch = jnp.asarray(adv_patch, jnp.float32)

    B, C, H, W = img_batch.shape
    P = C * H * W

    img2d = img_batch.reshape(B, P)
    alpha_arr = jnp.full((1, 1), alpha, dtype=jnp.float32)

    # Keep the patch un-broadcast over the batch axis: only materialize a
    # single image's worth ((C,H,W)) at most, never B copies in HBM.
    patch_is_batched = adv_patch.ndim == 4
    if patch_is_batched:
        patch2d = jnp.broadcast_to(adv_patch, (B, C, H, W)).reshape(B, P)
    else:
        patch2d = jnp.broadcast_to(adv_patch, (C, H, W)).reshape(1, P)

    tr = _pick_row_tile(B)
    tc = _pick_col_tile(P, tr)

    # Batch tiles innermost (fastest-varying) -> for a fixed patch column tile
    # the patch block index never changes across the inner loop, so its DMA is
    # elided and the tile stays VMEM-resident across the batch.
    grid = (P // tc, B // tr)

    img_spec = pl.BlockSpec((tr, tc), lambda pj, bi: (bi, pj))
    out_spec = pl.BlockSpec((tr, tc), lambda pj, bi: (bi, pj))
    if patch_is_batched:
        patch_spec = pl.BlockSpec((tr, tc), lambda pj, bi: (bi, pj))
    else:
        patch_spec = pl.BlockSpec((1, tc), lambda pj, bi: (0, pj))

    out2d = pl.pallas_call(
        _blend_kernel,
        out_shape=jax.ShapeDtypeStruct((B, P), jnp.float32),
        grid=grid,
        in_specs=[
            pl.BlockSpec(memory_space=pltpu.MemorySpace.SMEM),  # alpha scalar
            img_spec,
            patch_spec,
        ],
        out_specs=out_spec,
        compiler_params=pltpu.CompilerParams(
            dimension_semantics=("parallel", "parallel")),
    )(alpha_arr, img2d, patch2d)

    return out2d.reshape(B, C, H, W)


if __name__ == "__main__":
    key = jax.random.PRNGKey(0)
    k_img, k_patch = jax.random.split(key)

    B, C, H, W = 2, 4, 16, 16
    img_batch = jax.random.uniform(k_img, (B, C, H, W), dtype=jnp.float32)
    adv_patch = jax.random.uniform(k_patch, (C, H, W), dtype=jnp.float32)
    alpha = 0.25

    out = patch_applier(img_batch, adv_patch, alpha)
    out = jax.block_until_ready(out)

    # Reference check (pure JAX, same semantics as the PyTorch forward).
    ref = img_batch * (1.0 - alpha) + adv_patch * alpha
    assert out.shape == (B, C, H, W)
    assert jnp.allclose(out, ref, atol=1e-6), "mismatch vs reference"

    print("KERNEL_OK")
</pallas_src>

<mosaic_0001>
module attributes {stable_mosaic.version = 11 : i64} {
  func.func @_blend_kernel(%arg0: i32, %arg1: i32, %arg2: memref<1x1xf32, #tpu.memory_space<smem>>, %arg3: memref<2x1024xf32, #tpu.memory_space<vmem>>, %arg4: memref<1x1024xf32, #tpu.memory_space<vmem>>, %arg5: memref<2x1024xf32, #tpu.memory_space<vmem>>) attributes {dimension_semantics = [#tpu.dimension_semantics<parallel>, #tpu.dimension_semantics<parallel>], iteration_bounds = array<i64: 1, 1>, scalar_prefetch = 0 : i64, scratch_operands = 0 : i64, tpu.core_type = #tpu.core_type<tc>, window_params = [{transform_indices = @transform_0, window_bounds = array<i64: 1, 1>}, {transform_indices = @transform_1, window_bounds = array<i64: 2, 1024>}, {transform_indices = @transform_2, window_bounds = array<i64: 1, 1024>}, {transform_indices = @transform_3, window_bounds = array<i64: 2, 1024>}]} {
    %c0 = arith.constant 0 : index
    %c0_0 = arith.constant 0 : index
    %0 = memref.load %arg2[%c0, %c0_0] : memref<1x1xf32, #tpu.memory_space<smem>>
    %c0_1 = arith.constant 0 : index
    %c0_2 = arith.constant 0 : index
    %1 = vector.load %arg3[%c0_1, %c0_2] : memref<2x1024xf32, #tpu.memory_space<vmem>>, vector<2x1024xf32>
    %c0_3 = arith.constant 0 : index
    %c0_4 = arith.constant 0 : index
    %2 = vector.load %arg4[%c0_3, %c0_4] : memref<1x1024xf32, #tpu.memory_space<vmem>>, vector<1x1024xf32>
    %3 = vector.broadcast %2 : vector<1x1024xf32> to vector<2x1024xf32>
    %4 = arith.subf %3, %1 : vector<2x1024xf32>
    %5 = vector.broadcast %0 : f32 to vector<2x1024xf32>
    %6 = arith.mulf %5, %4 : vector<2x1024xf32>
    %7 = arith.addf %1, %6 : vector<2x1024xf32>
    %c0_5 = arith.constant 0 : index
    %c0_6 = arith.constant 0 : index
    %8 = vector.load %arg5[%c0_5, %c0_6] : memref<2x1024xf32, #tpu.memory_space<vmem>>, vector<2x1024xf32>
    tpu.vector_store %arg5[%c0_5, %c0_6], %7 {strides = array<i32>} : memref<2x1024xf32, #tpu.memory_space<vmem>>, vector<2x1024xf32>,
    return
  }
  func.func @transform_0(%arg0: i32, %arg1: i32) -> (i32, i32) {
    %c0_i32 = arith.constant 0 : i32
    %c0_i32_0 = arith.constant 0 : i32
    %c0_i32_1 = arith.constant 0 : i32
    return %c0_i32, %c0_i32_0 : i32, i32
  }
  func.func @transform_1(%arg0: i32, %arg1: i32) -> (i32, i32) {
    %c0_i32 = arith.constant 0 : i32
    return %arg1, %arg0 : i32, i32
  }
  func.func @transform_2(%arg0: i32, %arg1: i32) -> (i32, i32) {
    %c0_i32 = arith.constant 0 : i32
    %c0_i32_0 = arith.constant 0 : i32
    return %c0_i32, %arg0 : i32, i32
  }
  func.func @transform_3(%arg0: i32, %arg1: i32) -> (i32, i32) {
    %c0_i32 = arith.constant 0 : i32
    return %arg1, %arg0 : i32, i32
  }
}

</mosaic_0001>

<bundles_post_ra>
// kernel: tpu_custom_call.1
= control target key start
LH: loop header
LB: loop body
LE: loop exit
PB: predicated region body
PF: predicated region fallthrough
CT: control target
= control target key end

     0   :  { %9 = vsyncpa [#allocation4], 0  ;;  %s351_s0 = inlined_call_operand.<no memory space> [shape: f32[1,1], index: 0, kind: input, shape index: {}]   ;;  %s352_s1 = inlined_call_operand.hbm [shape: f32[2,1024], index: 1, kind: input, shape index: {}]   ;;  %s353_s2 = inlined_call_operand.hbm [shape: f32[1,1024], index: 2, kind: input, shape index: {}]   ;;  %s354_s3 = inlined_call_operand.hbm [shape: f32[2,1024], index: 3, kind: output, shape index: {}]  }
   0x1   :  { %10 = vsyncpa [#allocation7], 0 }
   0x2   :  { %11 = vsyncpa [#allocation5], 0  ;;  %s288_s12 = smov [#allocation3]   ;;  %s289_s14 = smov [#allocation6]  }
   0x3   :  { %s20_s13 = sshll.u32 %s288_s12, 4  ;;  %s30_s15 = sshll.u32 %s289_s14, 4  ;;  %s21_s13 = int_to_ptr.vmem [resolvable:$true] %s20_s13  ;;  %s31_s15 = int_to_ptr.vmem [resolvable:$true] %s30_s15 }
   0x4   :  { %s216_s18 = scalar_lea.hbm %s352_s1, 256 }
   0x5   :  { %p217_p0 = scmp.ne.s32.totalorder %s352_s1, %s216_s18  ;;  %p220_p1 = scmp.lt.u32.totalorder %s216_s18, %s352_s1 }
   0x7   :  { %p222_p2 = pnand %p220_p1, %p217_p0 }
   0x9   :  { %225 = shalt.err (!%p222_p2)
}
   0xa   :  { %s226_s23 = scalar_lea.vmem %s21_s13, 256  ;;  %p231_p4 = scmp.lt.s32.totalorder %s21_s13, %s21_s13 }
   0xb   :  { %p227_p3 = scmp.ne.s32.totalorder %s21_s13, %s226_s23  ;;  %p232_p5 = scmp.lt.s32.totalorder %s226_s23, %s226_s23 }
   0xd   :  { %p233_p6 = por %p232_p5, %p231_p4 }
   0xf   :  { %p234_p7 = pnand %p233_p6, %p227_p3 }
  0x11   :  { %237 = shalt.err (!%p234_p7)
}
  0x12   :  { %23 = dma.hbm_to_vmem [thread:$0]  %s352_s1, 256, %s21_s13, [#allocation4]  }
  0x13   :  { %s238_s28 = scalar_lea.hbm %s353_s2, 128 }
  0x14   :  { %p239_p8 = scmp.ne.s32.totalorder %s353_s2, %s238_s28  ;;  %p242_p9 = scmp.lt.u32.totalorder %s238_s28, %s353_s2 }
  0x16   :  { %p244_p10 = pnand %p242_p9, %p239_p8 }
  0x18   :  { %247 = shalt.err (!%p244_p10)
}
  0x19   :  { %s248_s6 = scalar_lea.vmem %s31_s15, 128  ;;  %p253_p12 = scmp.lt.s32.totalorder %s31_s15, %s31_s15 }
  0x1a   :  { %p249_p11 = scmp.ne.s32.totalorder %s31_s15, %s248_s6  ;;  %p254_p13 = scmp.lt.s32.totalorder %s248_s6, %s248_s6 }
  0x1c   :  { %p255_p0 = por %p254_p13, %p253_p12 }
  0x1e   :  { %p256_p1 = pnand %p255_p0, %p249_p11 }
  0x20   :  { %259 = shalt.err (!%p256_p1)
}
  0x21   :  { %33 = dma.hbm_to_vmem [thread:$0]  %s353_s2, 128, %s31_s15, [#allocation7]  }
  0x22   :  { %282 = dma.done.wait [#allocation4], 256  }
  0x23   :  { %283 = vsyncadd [#allocation4], 4294967040 }
  0x24   :  { %284 = dma.done.wait [#allocation7], 128  }
  0x25   :  { %285 = vsyncadd [#allocation7], 4294967168  ;;  %v45_v0 = vlaneseq  ;;  %v290_v1 = vmov 1983009808   ;;  %v41_v12 = vld [vmem:[#allocation3] sm:$0xff]  ;;  %v43_v13 = vld [vmem:[#allocation6] sm:$0xff]  ;;  %v137_v18 = vstv %s351_s0 }
  0x26   :  { %v89_v2 = vunpack.c.l.s4 %v290_v1  ;;  %v42_v15 = vld [vmem:[#allocation3 + $0x8] sm:$0xff]  ;;  %v87_v21 = vcombine.high %v41_v12, %v41_v12  ;;  %s291_s0 = smov [#allocation8]  }
  0x27   :  { %v46_v3 = vshrl.u32 %v45_v0, 7  ;;  %v104_v26 = vcombine.high %v42_v15, %v42_v15  ;;  %s200_s9 = sshll.u32 %s291_s0, 4  ;;  %s201_s9 = int_to_ptr.vmem [resolvable:$true] %s200_s9 }
  0x28   :  { %v90_v4 = vunpack.c.0.s8 %v89_v2  ;;  %s260_s10 = scalar_lea.vmem %s201_s9, 256  ;;  %p265_p3 = scmp.lt.s32.totalorder %s201_s9, %s201_s9 }
  0x29   :  { %v47_v5 = vsub.s32 0, %v46_v3  ;;  %v51_v6 = vsub.s32 1, %v46_v3  ;;  %v55_v7 = vsub.s32 2, %v46_v3  ;;  %v63_v9 = vsub.s32 4, %v46_v3  ;;  %p261_p2 = scmp.ne.s32.totalorder %s201_s9, %s260_s10  ;;  %p266_p4 = scmp.lt.s32.totalorder %s260_s10, %s260_s10 }
  0x2a   :  { %v93_v8 = vsub.s32 %v90_v4, %v46_v3  ;;  %v67_v10 = vsub.s32 5, %v46_v3  ;;  %v71_v11 = vsub.s32 6, %v46_v3  ;;  %v59_v14 = vsub.s32 3, %v46_v3 }
  0x2b   :  { %v48_v16 = vrot.slane %v43_v13, %v47_v5  ;;  %v52_v17 = vrot.slane %v43_v13, %v51_v6  ;;  %v75_v19 = vsub.s32 7, %v46_v3  ;;  %v56_v20 = vrot.slane %v43_v13, %v55_v7  ;;  %p267_p5 = por %p266_p4, %p265_p3 }
  0x2c   :  { %v94_v22 = vrot.slane %v41_v12, %v93_v8  ;;  %v64_v23 = vrot.slane %v43_v13, %v63_v9  ;;  %v68_v24 = vrot.slane %v43_v13, %v67_v10  ;;  %v72_v25 = vrot.slane %v43_v13, %v71_v11 }
  0x2d   :  { %v111_v27 = vrot.slane %v42_v15, %v93_v8  ;;  %v60_v28 = vrot.slane %v43_v13, %v59_v14  ;;  %v101_v29 = vrot.slane %v87_v21, %v93_v8  ;;  %v76_v32 = vrot.slane %v43_v13, %v75_v19  ;;  %p268_p6 = pnand %p267_p5, %p261_p2 }
  0x2e   :  { %v102_v30 = vcombine.high %v94_v22, %v94_v22  ;;  %v129_v31 = vsub.f32 %v48_v16, %v94_v22  ;;  %v118_v33 = vrot.slane %v104_v26, %v93_v8 }
  0x2f   :  { %v119_v34 = vcombine.high %v111_v27, %v111_v27  ;;  %v133_v35 = vsub.f32 %v64_v23, %v111_v27  ;;  %v103_v36 = vcombine.high %v101_v29, %v101_v29  ;;  %v131_v38 = vsub.f32 %v56_v20, %v101_v29 }
  0x30   :  { %v130_v37 = vsub.f32 %v52_v17, %v102_v30  ;;  %v138_v39 = vmul.f32 %v137_v18, %v129_v31  ;;  %v120_v40 = vcombine.high %v118_v33, %v118_v33  ;;  %v135_v42 = vsub.f32 %v72_v25, %v118_v33 }
  0x31   :  { %v134_v41 = vsub.f32 %v68_v24, %v119_v34  ;;  %v142_v43 = vmul.f32 %v137_v18, %v133_v35  ;;  %v132_v44 = vsub.f32 %v60_v28, %v103_v36  ;;  %v140_v46 = vmul.f32 %v137_v18, %v131_v38 }
  0x32   :  { %v139_v45 = vmul.f32 %v137_v18, %v130_v37  ;;  %v136_v47 = vsub.f32 %v76_v32, %v120_v40  ;;  %v144_v49 = vmul.f32 %v137_v18, %v135_v42 }
  0x33   :  { %v143_v48 = vmul.f32 %v137_v18, %v134_v41  ;;  %v141_v50 = vmul.f32 %v137_v18, %v132_v44 }
  0x34   :  { %v154_v51 = vcombine.low %v138_v39, %v139_v45  ;;  %v145_v52 = vmul.f32 %v137_v18, %v136_v47 }
  0x35   :  { %v171_v53 = vcombine.low %v142_v43, %v143_v48  ;;  %v155_v54 = vcombine.low %v140_v46, %v141_v50 }
  0x36   :  { %v162_v55 = vrot.slane %v154_v51, %v93_v8  ;;  %v172_v56 = vcombine.low %v144_v49, %v145_v52 }
  0x37   :  { %v179_v57 = vrot.slane %v171_v53, %v93_v8  ;;  %v169_v58 = vrot.slane %v155_v54, %v93_v8 }
  0x38   :  { %v186_v59 = vrot.slane %v172_v56, %v93_v8 }
  0x39   :  { %v170_v60 = vcombine.low %v162_v55, %v169_v58 }
  0x3a   :  { %v187_v61 = vcombine.low %v179_v57, %v186_v59 }
  0x3b   :  { %v190_v62 = vadd.f32 %v170_v60, %v41_v12 }
  0x3c   :  { %v191_v63 = vadd.f32 %v187_v61, %v42_v15 }
  0x3d   :  { %192 = vst [vmem:[#allocation8] sm:$0xff] %v190_v62 }
  0x3e   :  { %193 = vst [vmem:[#allocation8 + $0x8] sm:$0xff] %v191_v63 }
  0x3f   :  { %271 = shalt.err (!%p268_p6)
}
  0x40   :  { %s272_s13 = scalar_lea.hbm %s354_s3, 256 }
  0x41   :  { %p273_p7 = scmp.ne.s32.totalorder %s354_s3, %s272_s13  ;;  %p276_p8 = scmp.lt.u32.totalorder %s272_s13, %s354_s3 }
  0x43   :  { %p278_p9 = pnand %p276_p8, %p273_p7 }
  0x45   :  { %281 = shalt.err (!%p278_p9)
}
  0x46   :  { %203 = dma.vmem_to_hbm [thread:$0]  %s201_s9, 256, %s354_s3, [#allocation5]  }
  0x47   :  { %286 = dma.done.wait [#allocation5], 256  }
  0x48   :  { %287 = vsyncadd [#allocation5], 4294967040 }
  0x49   :  { %207 = vsyncpa [#allocation4], 1 }
  0x4a   :  { %208 = vsyncpa [#allocation7], 1 }
  0x4b   :  { %209 = vsyncpa [#allocation5], 1 }

</bundles_post_ra>
